<compile_context>
chip_gen: v7x
topology: tpu7x:2x2x1
jax: 0.10.0
libtpu: 0.0.40
codegen_flags: <defaults>
</compile_context>

<pallas_src>
import jax
import jax.numpy as jnp
from jax.experimental import pallas as pl
from jax.experimental.pallas import tpu as pltpu


def _normalize_kernel(x_ref, scale_ref, bias_ref, o_ref):
    # x_ref, o_ref:        VMEM blocks of shape (n_tile, C*H*W)
    # scale_ref, bias_ref: VMEM blocks of shape (1, C*H*W) — broadcast over the
    #                      batch sublanes.
    o_ref[...] = x_ref[...] * scale_ref[...] + bias_ref[...]


def _choose_n_tile(N, row_bytes, max_block_bytes=6 << 20):
    """Batch-tile rows per block.

    * Whole array fits under the budget -> single block (best for the single
      TensorCore on v5e/v6e; negligible either way at small sizes).
    * Otherwise a multiple-of-8 row count (keeps the block sublane-dense and
      tiling-legal with a ragged last block); big inputs then naturally give
      >=4 grid steps so both v7x TensorCores pipeline their DMAs.
    """
    n_fit = max(1, max_block_bytes // row_bytes)
    if n_fit >= N:
        return N
    # Round down to a multiple of 8; clamp to at least 8 so the sublane dim of
    # a partial-N block stays tiling-legal (rows are only ~KiB for CIFAR-scale
    # inputs, so this never meaningfully exceeds the budget here).
    return max(8, (n_fit // 8) * 8)


def normalize(x, mean, std):
    """x: (N, C, H, W), mean/std: (C,) -> (N, C, H, W) = (x - mean) / std."""
    N, C, H, W = x.shape
    assert mean.shape == (C,) and std.shape == (C,)
    hw = H * W
    F = C * hw
    x_flat = x.reshape(N, F)  # free metadata reshape; fully dense 2-D layout

    # Hoist constants in f32: (x - m)/s == x*(1/s) + (-m/s); expand to
    # lane-dense (1, F) rows matching the (N, C*H*W) flattening.
    mean_f = mean.astype(jnp.float32)
    std_f = std.astype(jnp.float32)
    scale_c = 1.0 / std_f
    bias_c = -mean_f / std_f
    scale = jnp.broadcast_to(scale_c[:, None], (C, hw)).reshape(1, F).astype(x.dtype)
    bias = jnp.broadcast_to(bias_c[:, None], (C, hw)).reshape(1, F).astype(x.dtype)

    row_bytes = F * x.dtype.itemsize
    n_tile = _choose_n_tile(N, row_bytes)
    grid = (pl.cdiv(N, n_tile),)  # ragged last block is fine for elementwise

    out_flat = pl.pallas_call(
        _normalize_kernel,
        out_shape=jax.ShapeDtypeStruct((N, F), x.dtype),
        grid_spec=pl.GridSpec(
            grid=grid,
            in_specs=[
                pl.BlockSpec((n_tile, F), lambda n: (n, 0)),  # x
                pl.BlockSpec((1, F), lambda n: (0, 0)),       # scale
                pl.BlockSpec((1, F), lambda n: (0, 0)),       # bias
            ],
            out_specs=pl.BlockSpec((n_tile, F), lambda n: (n, 0)),
        ),
        compiler_params=pltpu.CompilerParams(
            dimension_semantics=("parallel",),
            vmem_limit_bytes=48 << 20,
        ),
        cost_estimate=pl.CostEstimate(
            flops=2 * N * F,
            bytes_accessed=2 * N * F * x.dtype.itemsize,
            transcendentals=0,
        ),
    )(x_flat, scale, bias)

    return out_flat.reshape(N, C, H, W)


if __name__ == "__main__":
    key = jax.random.PRNGKey(0)
    N, C, H, W = 2, 3, 16, 16  # module hard-codes 3 channels (CIFAR-style)

    x = jax.random.uniform(key, (N, C, H, W), dtype=jnp.float32)

    # Deterministic "buffers" (CIFAR-100 normalization constants).
    mean = jnp.array([0.5071, 0.4865, 0.4409], dtype=jnp.float32)
    std = jnp.array([0.2673, 0.2564, 0.2762], dtype=jnp.float32)

    out = normalize(x, mean, std)
    out = jax.block_until_ready(out)

    # Reference check against plain JAX (same semantics as the PyTorch module).
    ref = (x - mean.reshape(1, C, 1, 1)) / std.reshape(1, C, 1, 1)
    assert out.shape == x.shape and out.dtype == x.dtype
    assert jnp.allclose(out, ref, atol=1e-5, rtol=1e-5)

    print("KERNEL_OK")
</pallas_src>

<mosaic_0001>
module attributes {stable_mosaic.version = 11 : i64} {
  func.func @_normalize_kernel(%arg0: i32, %arg1: memref<2x768xf32, #tpu.memory_space<vmem>>, %arg2: memref<1x768xf32, #tpu.memory_space<vmem>>, %arg3: memref<1x768xf32, #tpu.memory_space<vmem>>, %arg4: memref<2x768xf32, #tpu.memory_space<vmem>>) attributes {dimension_semantics = [#tpu.dimension_semantics<parallel>], iteration_bounds = array<i64: 1>, scalar_prefetch = 0 : i64, scratch_operands = 0 : i64, tpu.core_type = #tpu.core_type<tc>, window_params = [{transform_indices = @transform_0, window_bounds = array<i64: 2, 768>}, {pipeline_mode = #tpu.pipeline_mode<synchronous>, transform_indices = @transform_1, window_bounds = array<i64: 1, 768>}, {pipeline_mode = #tpu.pipeline_mode<synchronous>, transform_indices = @transform_2, window_bounds = array<i64: 1, 768>}, {transform_indices = @transform_3, window_bounds = array<i64: 2, 768>}]} {
    %c0 = arith.constant 0 : index
    %c0_0 = arith.constant 0 : index
    %0 = vector.load %arg1[%c0, %c0_0] : memref<2x768xf32, #tpu.memory_space<vmem>>, vector<2x768xf32>
    %c0_1 = arith.constant 0 : index
    %c0_2 = arith.constant 0 : index
    %1 = vector.load %arg2[%c0_1, %c0_2] : memref<1x768xf32, #tpu.memory_space<vmem>>, vector<1x768xf32>
    %2 = vector.broadcast %1 : vector<1x768xf32> to vector<2x768xf32>
    %3 = arith.mulf %0, %2 : vector<2x768xf32>
    %c0_3 = arith.constant 0 : index
    %c0_4 = arith.constant 0 : index
    %4 = vector.load %arg3[%c0_3, %c0_4] : memref<1x768xf32, #tpu.memory_space<vmem>>, vector<1x768xf32>
    %5 = vector.broadcast %4 : vector<1x768xf32> to vector<2x768xf32>
    %6 = arith.addf %3, %5 : vector<2x768xf32>
    %c0_5 = arith.constant 0 : index
    %c0_6 = arith.constant 0 : index
    %7 = vector.load %arg4[%c0_5, %c0_6] : memref<2x768xf32, #tpu.memory_space<vmem>>, vector<2x768xf32>
    tpu.vector_store %arg4[%c0_5, %c0_6], %6 {strides = array<i32>} : memref<2x768xf32, #tpu.memory_space<vmem>>, vector<2x768xf32>,
    return
  }
  func.func @transform_0(%arg0: i32) -> (i32, i32) {
    %c0_i32 = arith.constant 0 : i32
    %c0_i32_0 = arith.constant 0 : i32
    return %arg0, %c0_i32 : i32, i32
  }
  func.func @transform_1(%arg0: i32) -> (i32, i32) {
    %c0_i32 = arith.constant 0 : i32
    %c0_i32_0 = arith.constant 0 : i32
    %c0_i32_1 = arith.constant 0 : i32
    return %c0_i32, %c0_i32_0 : i32, i32
  }
  func.func @transform_2(%arg0: i32) -> (i32, i32) {
    %c0_i32 = arith.constant 0 : i32
    %c0_i32_0 = arith.constant 0 : i32
    %c0_i32_1 = arith.constant 0 : i32
    return %c0_i32, %c0_i32_0 : i32, i32
  }
  func.func @transform_3(%arg0: i32) -> (i32, i32) {
    %c0_i32 = arith.constant 0 : i32
    %c0_i32_0 = arith.constant 0 : i32
    return %arg0, %c0_i32 : i32, i32
  }
}

</mosaic_0001>

<bundles_post_ra>
// kernel: tpu_custom_call.1
= control target key start
LH: loop header
LB: loop body
LE: loop exit
PB: predicated region body
PF: predicated region fallthrough
CT: control target
= control target key end

     0   :  { %8 = vsyncpa [#allocation3], 0  ;;  %s308_s0 = inlined_call_operand.hbm [shape: f32[2,768], index: 0, kind: input, shape index: {}]   ;;  %s309_s1 = inlined_call_operand.hbm [shape: f32[1,768], index: 1, kind: input, shape index: {}]   ;;  %s310_s2 = inlined_call_operand.vmem [shape: f32[1,768], index: 2, kind: input, shape index: {}]   ;;  %s311_s3 = inlined_call_operand.hbm [shape: f32[2,768], index: 3, kind: output, shape index: {}]  }
   0x1   :  { %9 = vsyncpa [#allocation6], 0 }
   0x2   :  { %10 = vsyncpa [#allocation4], 0  ;;  %s245_s12 = smov [#allocation2]   ;;  %s246_s14 = smov [#allocation5]  }
   0x3   :  { %s17_s13 = sshll.u32 %s245_s12, 4  ;;  %s27_s15 = sshll.u32 %s246_s14, 4  ;;  %s18_s13 = int_to_ptr.vmem [resolvable:$true] %s17_s13  ;;  %s28_s15 = int_to_ptr.vmem [resolvable:$true] %s27_s15 }
   0x4   :  { %s173_s18 = scalar_lea.hbm %s308_s0, 192 }
   0x5   :  { %p174_p0 = scmp.ne.s32.totalorder %s308_s0, %s173_s18  ;;  %p177_p1 = scmp.lt.u32.totalorder %s173_s18, %s308_s0 }
   0x7   :  { %p179_p2 = pnand %p177_p1, %p174_p0 }
   0x9   :  { %182 = shalt.err (!%p179_p2)
}
   0xa   :  { %s183_s23 = scalar_lea.vmem %s18_s13, 192  ;;  %p188_p4 = scmp.lt.s32.totalorder %s18_s13, %s18_s13 }
   0xb   :  { %p184_p3 = scmp.ne.s32.totalorder %s18_s13, %s183_s23  ;;  %p189_p5 = scmp.lt.s32.totalorder %s183_s23, %s183_s23 }
   0xd   :  { %p190_p6 = por %p189_p5, %p188_p4 }
   0xf   :  { %p191_p7 = pnand %p190_p6, %p184_p3 }
  0x11   :  { %194 = shalt.err (!%p191_p7)
}
  0x12   :  { %20 = dma.hbm_to_vmem [thread:$0]  %s308_s0, 192, %s18_s13, [#allocation3]  }
  0x13   :  { %s195_s28 = scalar_lea.hbm %s309_s1, 96 }
  0x14   :  { %p196_p8 = scmp.ne.s32.totalorder %s309_s1, %s195_s28  ;;  %p199_p9 = scmp.lt.u32.totalorder %s195_s28, %s309_s1 }
  0x16   :  { %p201_p10 = pnand %p199_p9, %p196_p8 }
  0x18   :  { %204 = shalt.err (!%p201_p10)
}
  0x19   :  { %s205_s6 = scalar_lea.vmem %s28_s15, 96  ;;  %p210_p12 = scmp.lt.s32.totalorder %s28_s15, %s28_s15 }
  0x1a   :  { %p206_p11 = scmp.ne.s32.totalorder %s28_s15, %s205_s6  ;;  %p211_p13 = scmp.lt.s32.totalorder %s205_s6, %s205_s6 }
  0x1c   :  { %p212_p0 = por %p211_p13, %p210_p12 }
  0x1e   :  { %p213_p1 = pnand %p212_p0, %p206_p11 }
  0x20   :  { %216 = shalt.err (!%p213_p1)
}
  0x21   :  { %30 = dma.hbm_to_vmem [thread:$0]  %s309_s1, 96, %s28_s15, [#allocation6]  }
  0x22   :  { %239 = dma.done.wait [#allocation3], 192  }
  0x23   :  { %240 = vsyncadd [#allocation3], 4294967104 }
  0x24   :  { %241 = dma.done.wait [#allocation6], 96  }
  0x25   :  { %242 = vsyncadd [#allocation6], 4294967200  ;;  %v43_v0 = vlaneseq  ;;  %v247_v1 = vmov 1983009808   ;;  %v41_v11 = vld [vmem:[#allocation5] sm:$0x3f] }
  0x26   :  { %v70_v2 = vunpack.c.l.s4 %v247_v1  ;;  %v96_v13 = vld [vmem:[%s310_s2] sm:$0x3f]  ;;  %v40_v36 = vld [vmem:[#allocation2 + $0x8] sm:$0xf]  ;;  %s248_s1 = smov [#allocation7]  }
  0x27   :  { %v44_v3 = vshrl.u32 %v43_v0, 7  ;;  %v39_v33 = vld [vmem:[#allocation2] sm:$0xff]  ;;  %s159_s2 = sshll.u32 %s248_s1, 4  ;;  %s160_s2 = int_to_ptr.vmem [resolvable:$true] %s159_s2 }
  0x28   :  { %v71_v4 = vunpack.c.0.s8 %v70_v2  ;;  %s217_s10 = scalar_lea.vmem %s160_s2, 192  ;;  %p222_p3 = scmp.lt.s32.totalorder %s160_s2, %s160_s2 }
  0x29   :  { %v45_v5 = vsub.s32 0, %v44_v3  ;;  %v49_v6 = vsub.s32 1, %v44_v3  ;;  %v53_v7 = vsub.s32 2, %v44_v3  ;;  %v57_v8 = vsub.s32 3, %v44_v3  ;;  %p218_p2 = scmp.ne.s32.totalorder %s160_s2, %s217_s10  ;;  %p223_p4 = scmp.lt.s32.totalorder %s217_s10, %s217_s10 }
  0x2a   :  { %v61_v9 = vsub.s32 4, %v44_v3  ;;  %v65_v10 = vsub.s32 5, %v44_v3  ;;  %v74_v12 = vsub.s32 %v71_v4, %v44_v3 }
  0x2b   :  { %v46_v14 = vrot.slane %v41_v11, %v45_v5  ;;  %v50_v15 = vrot.slane %v41_v11, %v49_v6  ;;  %v54_v16 = vrot.slane %v41_v11, %v53_v7  ;;  %v58_v17 = vrot.slane %v41_v11, %v57_v8  ;;  %p224_p5 = por %p223_p4, %p222_p3 }
  0x2c   :  { %v101_v18 = vrot.slane %v96_v13, %v45_v5  ;;  %v105_v19 = vrot.slane %v96_v13, %v49_v6  ;;  %v109_v20 = vrot.slane %v96_v13, %v53_v7  ;;  %v113_v21 = vrot.slane %v96_v13, %v57_v8 }
  0x2d   :  { %v67_v22 = vcombine.low %v46_v14, %v50_v15  ;;  %v68_v23 = vcombine.low %v54_v16, %v58_v17  ;;  %v62_v24 = vrot.slane %v41_v11, %v61_v9  ;;  %v66_v25 = vrot.slane %v41_v11, %v65_v10  ;;  %p225_p6 = pnand %p224_p5, %p218_p2 }
  0x2e   :  { %v122_v26 = vcombine.low %v101_v18, %v105_v19  ;;  %v123_v27 = vcombine.low %v109_v20, %v113_v21  ;;  %v117_v28 = vrot.slane %v96_v13, %v61_v9  ;;  %v121_v29 = vrot.slane %v96_v13, %v65_v10 }
  0x2f   :  { %v75_v30 = vrot.slane %v67_v22, %v74_v12  ;;  %v82_v31 = vrot.slane %v68_v23, %v74_v12  ;;  %v84_v32 = vcombine.low %v62_v24, %v66_v25 }
  0x30   :  { %v130_v34 = vrot.slane %v122_v26, %v74_v12  ;;  %v137_v35 = vrot.slane %v123_v27, %v74_v12  ;;  %v139_v37 = vcombine.low %v117_v28, %v121_v29 }
  0x31   :  { %v83_v38 = vcombine.low %v75_v30, %v82_v31  ;;  %v91_v39 = vrot.slane %v84_v32, %v74_v12 }
  0x32   :  { %v138_v40 = vcombine.low %v130_v34, %v137_v35  ;;  %v146_v41 = vrot.slane %v139_v37, %v74_v12 }
  0x33   :  { %v94_v42 = vmul.f32 %v83_v38, %v39_v33  ;;  %v95_v43 = vmul.f32 %v91_v39, %v40_v36 }
  0x35   :  { %v149_v44 = vadd.f32 %v138_v40, %v94_v42  ;;  %v150_v45 = vadd.f32 %v146_v41, %v95_v43 }
  0x37   :  { %151 = vst [vmem:[#allocation7] sm:$0xff] %v149_v44  ;;  %152 = vst [vmem:[#allocation7 + $0x8] sm:$0xf] %v150_v45 }
  0x38   :  { %228 = shalt.err (!%p225_p6)
}
  0x39   :  { %s229_s13 = scalar_lea.hbm %s311_s3, 192 }
  0x3a   :  { %p230_p7 = scmp.ne.s32.totalorder %s311_s3, %s229_s13  ;;  %p233_p8 = scmp.lt.u32.totalorder %s229_s13, %s311_s3 }
  0x3c   :  { %p235_p9 = pnand %p233_p8, %p230_p7 }
  0x3e   :  { %238 = shalt.err (!%p235_p9)
}
  0x3f   :  { %162 = dma.vmem_to_hbm [thread:$0]  %s160_s2, 192, %s311_s3, [#allocation4]  }
  0x40   :  { %243 = dma.done.wait [#allocation4], 192  }
  0x41   :  { %244 = vsyncadd [#allocation4], 4294967104 }
  0x42   :  { %166 = vsyncpa [#allocation3], 1 }
  0x43   :  { %167 = vsyncpa [#allocation6], 1 }
  0x44   :  { %168 = vsyncpa [#allocation4], 1 }

</bundles_post_ra>
